<compile_context>
chip_gen: v7x
topology: tpu7x:2x2x1
jax: 0.10.0
libtpu: 0.0.40
codegen_flags: <defaults>
</compile_context>

<pallas_src>
import numpy as np
import jax
import jax.numpy as jnp
from jax.experimental import pallas as pl
from jax.experimental.pallas import tpu as pltpu

BN_EPS = 1e-5
MM_DTYPE = jnp.bfloat16        # fast MXU path on v5e/v6e/v7x; accumulation is f32


def _round_up(x, m):
    return ((x + m - 1) // m) * m


# ----------------------------------------------------------------------------
# Pass 1: ReLU + BatchNorm batch statistics (per-channel sum / sum-of-squares)
# ----------------------------------------------------------------------------
def _bn_stats_kernel(x_ref, out_ref):
    # x_ref: (ts, C) tile (native dtype).  out_ref: (8, C) partial-stat block,
    # resident across the inner (reduction) grid axis; row 0 = sum, row 1 = sumsq.
    @pl.when(pl.program_id(1) == 0)
    def _():
        out_ref[...] = jnp.zeros_like(out_ref)

    x = jnp.maximum(x_ref[...].astype(jnp.float32), 0.0)   # ReLU precedes BN
    s = jnp.sum(x, axis=0, keepdims=True)
    q = jnp.sum(x * x, axis=0, keepdims=True)
    pad = jnp.zeros((6, x.shape[1]), jnp.float32)
    out_ref[...] += jnp.concatenate([s, q, pad], axis=0)    # dense (8, C) store


def _relu_bn_stats(x_flat):
    """Per-channel mean / biased variance of relu(x_flat), x_flat: (n, C)."""
    n_rows, C = x_flat.shape
    # Two partial-sum slabs -> both TensorCores can work on v7x (neutral on
    # single-TC v5e/v6e); ~4 MiB per input block, sublane-aligned, minimal pad.
    P = 2 if n_rows >= 16 else 1
    ts_cap = max(8, ((1 << 22) // (4 * C)) // 8 * 8)
    ts0 = min(ts_cap, _round_up(pl.cdiv(n_rows, P), 8))
    inner = pl.cdiv(n_rows, P * ts0)
    ts = _round_up(pl.cdiv(n_rows, P * inner), 8)           # shrink -> least padding
    npad = P * inner * ts
    if npad != n_rows:
        # zero rows: relu(0) = 0 -> no contribution to either sum
        x_flat = jnp.pad(x_flat, ((0, npad - n_rows), (0, 0)))

    stats = pl.pallas_call(
        _bn_stats_kernel,
        out_shape=jax.ShapeDtypeStruct((P * 8, C), jnp.float32),
        grid=(P, inner),
        in_specs=[pl.BlockSpec((ts, C), lambda p, i: (p * inner + i, 0))],
        out_specs=pl.BlockSpec((8, C), lambda p, i: (p, 0)),
        compiler_params=pltpu.CompilerParams(
            dimension_semantics=("parallel", "arbitrary"),
            vmem_limit_bytes=32 * 1024 * 1024),
    )(x_flat)

    parts = stats.reshape(P, 8, C)
    mean = jnp.sum(parts[:, 0, :], axis=0) / n_rows
    var = jnp.sum(parts[:, 1, :], axis=0) / n_rows - mean * mean
    var = jnp.maximum(var, 0.0)            # guard against f32 cancellation
    return mean, var


# ----------------------------------------------------------------------------
# Pass 2: conv-as-matmul, tiled over (spatial rows, Cout, K) with f32 VMEM acc
# ----------------------------------------------------------------------------
def _matmul_kernel(a_ref, b_ref, o_ref, acc_ref):
    @pl.when(pl.program_id(2) == 0)
    def _():
        acc_ref[...] = jnp.zeros_like(acc_ref)

    acc_ref[...] += jnp.dot(a_ref[...], b_ref[...],
                            preferred_element_type=jnp.float32)

    @pl.when(pl.program_id(2) == pl.num_programs(2) - 1)
    def _():
        o_ref[...] = acc_ref[...].astype(o_ref.dtype)


def _tiled_matmul(a, b, *, tn, tk, tco, out_dtype):
    N, K = a.shape
    K2, M = b.shape
    assert K == K2 and N % tn == 0 and K % tk == 0 and M % tco == 0
    out_bytes = jnp.dtype(out_dtype).itemsize
    # double-buffered bf16 inputs + double-buffered output + f32 accumulator
    vmem_need = (2 * (tn * tk + tk * tco) * a.dtype.itemsize
                 + 2 * tn * tco * out_bytes
                 + tn * tco * 4)
    vmem_limit = int(min(48 * 1024 * 1024, max(32 * 1024 * 1024, 2 * vmem_need)))
    return pl.pallas_call(
        _matmul_kernel,
        out_shape=jax.ShapeDtypeStruct((N, M), out_dtype),
        grid=(N // tn, M // tco, K // tk),        # reduction axis last
        in_specs=[pl.BlockSpec((tn, tk), lambda i, j, k: (i, k)),
                  pl.BlockSpec((tk, tco), lambda i, j, k: (k, j))],
        out_specs=pl.BlockSpec((tn, tco), lambda i, j, k: (i, j)),
        scratch_shapes=[pltpu.VMEM((tn, tco), jnp.float32)],
        compiler_params=pltpu.CompilerParams(
            dimension_semantics=("parallel", "parallel", "arbitrary"),
            vmem_limit_bytes=vmem_limit),
    )(a, b)


# ----------------------------------------------------------------------------
# Conv3x3 module: parameter prep (weight cast/reshape/pad hoisted here)
# ----------------------------------------------------------------------------
def _plan_conv_tiles(cin, cout):
    K = 9 * cin
    tk = min(512, _round_up(K, 128))
    tco = min(1024, _round_up(cout, 128))
    return tk, tco, _round_up(K, tk), _round_up(cout, tco)


def make_conv3x3_params(key, cin, cout):
    k1, k2, k3 = jax.random.split(key, 3)
    w = 0.1 * jax.random.normal(k1, (3, 3, cin, cout), jnp.float32)   # HWIO
    gamma = 1.0 + 0.1 * jax.random.normal(k2, (cin,), jnp.float32)
    beta = 0.1 * jax.random.normal(k3, (cin,), jnp.float32)
    tk, tco, kp, cp = _plan_conv_tiles(cin, cout)
    # Hoisted out of the forward path: bf16 cast + (9*Cin, Cout) reshape + pad.
    w2 = w.astype(MM_DTYPE).reshape(9 * cin, cout)
    w2p = jnp.pad(w2, ((0, kp - 9 * cin), (0, cp - cout)))
    return dict(cin=cin, cout=cout, gamma=gamma, beta=beta,
                w_hwio=w, w2p=w2p, tk=tk, tco=tco, kp=kp, cp=cp)


# ----------------------------------------------------------------------------
# Conv3x3 forward (NHWC in, NHWC out)
# ----------------------------------------------------------------------------
def conv3x3_block(x_nhwc, op, *, out_dtype):
    """relu -> BatchNorm2d (training-mode batch stats) -> conv3x3(stride=2, pad=1)."""
    B, H, W, C = x_nhwc.shape
    assert C == op["cin"] and H % 2 == 0 and W % 2 == 0
    OH, OW = H // 2, W // 2
    Cout = op["cout"]
    n = B * OH * OW
    K = 9 * C

    # ---- pass 1 (Pallas): BN batch statistics of relu(x), native dtype ----
    mean, var = _relu_bn_stats(x_nhwc.reshape(B * H * W, C))
    scale = op["gamma"] * jax.lax.rsqrt(var + BN_EPS)
    shift = op["beta"] - mean * scale

    # ---- glue (XLA): relu + BN affine + conv zero-pad + im2col, fused; the
    # affine is applied here so the conv zero-padding stays exactly zero. ----
    y = (jnp.maximum(x_nhwc, 0.0) * scale + shift).astype(MM_DTYPE)
    yp = jnp.pad(y, ((0, 0), (1, 1), (1, 1), (0, 0)))        # conv padding = 1
    taps = [yp[:, kh:kh + H:2, kw:kw + W:2, :]               # stride-2 windows
            for kh in range(3) for kw in range(3)]
    patches = jnp.concatenate(taps, axis=-1).reshape(n, K)   # (n, 9*Cin)

    # ---- row tile: a single tile (weight streamed from HBM exactly once)
    # whenever n <= 1024, else 512-row tiles; 16-aligned for bf16 packing.
    tn = _round_up(n, 16) if n <= 1024 else 512
    np_rows = _round_up(n, tn)
    patches = jnp.pad(patches, ((0, np_rows - n), (0, op["kp"] - K)))

    # ---- pass 2 (Pallas): tiled matmul on the MXU ----
    out = _tiled_matmul(patches, op["w2p"], tn=tn, tk=op["tk"], tco=op["tco"],
                        out_dtype=out_dtype)
    return out[:n, :Cout].reshape(B, OH, OW, Cout)           # NHWC


# ----------------------------------------------------------------------------
# SpatialModulation
# ----------------------------------------------------------------------------
def init_spatial_modulation(key, inplanes=(4, 8), planes=8):
    """Mirrors SpatialModulation.__init__ parameter structure (synthetic init)."""
    params = []
    for dim in inplanes:
        ds_factor = planes // dim
        ds_num = int(np.log2(ds_factor))
        ops = []
        if ds_num >= 1:
            for dsi in range(ds_num):
                cin = dim * (2 ** dsi)
                cout = dim * (2 ** (dsi + 1))
                key, sub = jax.random.split(key)
                ops.append(make_conv3x3_params(sub, cin, cout))
        params.append(ops)          # empty list == Identity branch
    return params


def spatial_modulation_forward(inputs, params):
    out = []
    for x, ops in zip(inputs, params):
        if not ops:                 # Identity branch
            out.append(x)
            continue
        h = jnp.transpose(x, (0, 2, 3, 1))               # NCHW -> NHWC once
        for j, op in enumerate(ops):
            last = (j == len(ops) - 1)
            # Intermediate blocks stay bf16 NHWC (halves writeback, no relayout);
            # only the branch's final block emits f32 for the module output.
            h = conv3x3_block(h, op,
                              out_dtype=jnp.float32 if last else MM_DTYPE)
        out.append(jnp.transpose(h, (0, 3, 1, 2)))        # back to NCHW
    return out


# ----------------------------------------------------------------------------
# Pure-JAX reference (mirrors the kernel's bf16 MXU inputs / f32 accumulation
# and bf16 intermediates between chained blocks)
# ----------------------------------------------------------------------------
def _reference_branch(x_nchw, ops):
    h = x_nchw
    for j, op in enumerate(ops):
        y = jnp.maximum(h.astype(jnp.float32), 0.0)
        mean = jnp.mean(y, axis=(0, 2, 3), keepdims=True)
        var = jnp.mean(y * y, axis=(0, 2, 3), keepdims=True) - mean * mean
        scale = op["gamma"].reshape(1, -1, 1, 1) * jax.lax.rsqrt(var + BN_EPS)
        shift = op["beta"].reshape(1, -1, 1, 1) - mean * scale
        y = (y * scale + shift).astype(MM_DTYPE).astype(jnp.float32)
        w = op["w_hwio"].astype(MM_DTYPE).astype(jnp.float32)
        w_oihw = jnp.transpose(w, (3, 2, 0, 1))
        h = jax.lax.conv_general_dilated(
            y, w_oihw, window_strides=(2, 2), padding=((1, 1), (1, 1)),
            dimension_numbers=("NCHW", "OIHW", "NCHW"))
        if j < len(ops) - 1:
            h = h.astype(MM_DTYPE)      # mirror kernel's bf16 intermediate
    return h


if __name__ == "__main__":
    key = jax.random.PRNGKey(0)
    key, kx0, kx1, kx2, kp1, kp2 = jax.random.split(key, 6)

    # Small-shape analogue of SpatialModulation(inplanes=[1024, 2048], planes=2048):
    # inplanes=(4, 8), planes=8 -> branch 0: one Conv3x3(4->8, stride 2); branch 1: Identity.
    B = 2
    x0 = jax.random.normal(kx0, (B, 4, 16, 16), jnp.float32)   # conv branch, NCHW
    x1 = jax.random.normal(kx1, (B, 8, 8, 8), jnp.float32)     # identity branch, NCHW

    params = init_spatial_modulation(kp1, (4, 8), 8)
    outs = spatial_modulation_forward([x0, x1], params)
    outs = [jax.block_until_ready(o) for o in outs]

    assert outs[0].shape == (B, 8, 8, 8) and outs[0].dtype == jnp.float32
    ref0 = _reference_branch(x0, params[0])
    np.testing.assert_allclose(np.asarray(outs[0]), np.asarray(ref0),
                               rtol=5e-3, atol=5e-3)
    np.testing.assert_allclose(np.asarray(outs[1]), np.asarray(x1), rtol=0, atol=0)

    # Chained branch (ds_num = 2): Conv3x3(2->4) -> Conv3x3(4->8); exercises the
    # bf16 NHWC intermediate path between stacked blocks.
    x2 = jax.random.normal(kx2, (B, 2, 16, 16), jnp.float32)
    params2 = init_spatial_modulation(kp2, (2,), 8)
    outs2 = spatial_modulation_forward([x2], params2)
    outs2 = [jax.block_until_ready(o) for o in outs2]
    assert outs2[0].shape == (B, 8, 4, 4) and outs2[0].dtype == jnp.float32
    ref2 = _reference_branch(x2, params2[0])
    np.testing.assert_allclose(np.asarray(outs2[0]), np.asarray(ref2),
                               rtol=2e-2, atol=2e-2)

    print("KERNEL_OK")
</pallas_src>

<mosaic_0001>
module attributes {stable_mosaic.version = 11 : i64} {
  func.func @_bn_stats_kernel(%arg0: i32, %arg1: i32, %arg2: memref<256x4xf32, #tpu.memory_space<vmem>>, %arg3: memref<8x4xf32, #tpu.memory_space<vmem>>) attributes {dimension_semantics = [#tpu.dimension_semantics<parallel>, #tpu.dimension_semantics<arbitrary>], iteration_bounds = array<i64: 2, 1>, scalar_prefetch = 0 : i64, scratch_operands = 0 : i64, tpu.core_type = #tpu.core_type<tc>, window_params = [{transform_indices = @transform_0, window_bounds = array<i64: 256, 4>}, {transform_indices = @transform_1, window_bounds = array<i64: 8, 4>}]} {
    %c0_i32 = arith.constant 0 : i32
    %0 = arith.cmpi eq, %arg1, %c0_i32 : i32
    %1 = arith.extui %0 : i1 to i32
    %c0_i32_0 = arith.constant 0 : i32
    %2 = arith.cmpi ne, %1, %c0_i32_0 : i32
    scf.if %2 {
      %cst_9 = arith.constant 0.000000e+00 : f32
      %16 = vector.broadcast %cst_9 : f32 to vector<8x4xf32>
      %c0_10 = arith.constant 0 : index
      %c0_11 = arith.constant 0 : index
      %17 = vector.load %arg3[%c0_10, %c0_11] : memref<8x4xf32, #tpu.memory_space<vmem>>, vector<8x4xf32>
      tpu.vector_store %arg3[%c0_10, %c0_11], %16 {strides = array<i32>} : memref<8x4xf32, #tpu.memory_space<vmem>>, vector<8x4xf32>,
    } else {
    }
    %c0 = arith.constant 0 : index
    %c0_1 = arith.constant 0 : index
    %3 = vector.load %arg2[%c0, %c0_1] : memref<256x4xf32, #tpu.memory_space<vmem>>, vector<256x4xf32>
    %cst = arith.constant 0.000000e+00 : f32
    %4 = vector.broadcast %cst : f32 to vector<256x4xf32>
    %5 = arith.maximumf %3, %4 : vector<256x4xf32>
    %cst_2 = arith.constant dense<0.000000e+00> : vector<4xf32>
    %6 = vector.multi_reduction <add>, %5, %cst_2 [0] : vector<256x4xf32> to vector<4xf32>
    %7 = vector.shape_cast %6 : vector<4xf32> to vector<1x4xf32>
    %8 = arith.mulf %5, %5 : vector<256x4xf32>
    %cst_3 = arith.constant dense<0.000000e+00> : vector<4xf32>
    %9 = vector.multi_reduction <add>, %8, %cst_3 [0] : vector<256x4xf32> to vector<4xf32>
    %10 = vector.shape_cast %9 : vector<4xf32> to vector<1x4xf32>
    %cst_4 = arith.constant 0.000000e+00 : f32
    %11 = vector.broadcast %cst_4 : f32 to vector<6x4xf32>
    %c0_5 = arith.constant 0 : index
    %c0_6 = arith.constant 0 : index
    %12 = vector.load %arg3[%c0_5, %c0_6] : memref<8x4xf32, #tpu.memory_space<vmem>>, vector<8x4xf32>
    %13 = tpu.concatenate %7, %10, %11 in 0 : vector<1x4xf32>, vector<1x4xf32>, vector<6x4xf32> -> vector<8x4xf32>
    %14 = arith.addf %12, %13 : vector<8x4xf32>
    %c0_7 = arith.constant 0 : index
    %c0_8 = arith.constant 0 : index
    %15 = vector.load %arg3[%c0_7, %c0_8] : memref<8x4xf32, #tpu.memory_space<vmem>>, vector<8x4xf32>
    tpu.vector_store %arg3[%c0_7, %c0_8], %14 {strides = array<i32>} : memref<8x4xf32, #tpu.memory_space<vmem>>, vector<8x4xf32>,
    return
  }
  func.func @transform_0(%arg0: i32, %arg1: i32) -> (i32, i32) {
    %c1_i32 = arith.constant 1 : i32
    %0 = arith.muli %arg0, %c1_i32 : i32
    %1 = arith.addi %0, %arg1 : i32
    %c0_i32 = arith.constant 0 : i32
    %c0_i32_0 = arith.constant 0 : i32
    return %1, %c0_i32 : i32, i32
  }
  func.func @transform_1(%arg0: i32, %arg1: i32) -> (i32, i32) {
    %c0_i32 = arith.constant 0 : i32
    %c0_i32_0 = arith.constant 0 : i32
    return %arg0, %c0_i32 : i32, i32
  }
}

</mosaic_0001>

<bundles_post_ra>
// kernel: tpu_custom_call.1
= control target key start
LH: loop header
LB: loop body
LE: loop exit
PB: predicated region body
PF: predicated region fallthrough
CT: control target
= control target key end

     0   :  { %s515_s6 = smov 0   ;;  %s517_s7 = smov 0   ;;  %s653_s0 = inlined_call_operand.vmem [shape: f32[512,4], index: 0, kind: input, shape index: {}]   ;;  %s654_s1 = inlined_call_operand.vmem [shape: f32[16,4], index: 1, kind: output, shape index: {}]  }
   0x1   :  { %s519_s8 = smov 0  }
   0x2 LB: > { %s23_s9 = sadd.s32 1, %s498_s7  ;;  %p449_p0 = scmp.ge.s32.totalorder %s502_s8, 1  ;;  %s502_s8 = sphi %s519_s8, %s11_s8   ;;  %s498_s7 = sphi %s517_s7, %s656_s7   ;;  %s494_s6 = sphi %s515_s6, %s655_s6  }
   0x3   : > { %p25_p1 = scmp.ge.s32.totalorder %s23_s9, 2  ;;  %p104_p2 = scmp.lt.s32.totalorder %s502_s8, 3 }
   0x5   : > { %s658_s9 = smov (%p25_p1, %s23_s9), 0  ;;  %p105_p3 = pnand %p449_p0, %p104_p2 }
   0x6   : > { %s450_s10 = sshll.u32 (!%p105_p3), %s494_s6, 5  ;;  %p132_p4 = scmp.lt.s32.totalorder (!%p105_p3), %s494_s6, 1  ;;  %vm140_vm0 = vcmask (!%p105_p3), 31744   ;;  %v504_v0 = vmov (!%p105_p3), 0.0   ;;  %vm378_vm1 = vcmask (!%p105_p3), 1040384   ;;  %vm380_vm2 = vcmask (!%p105_p3), 1041408  }
   0x7   : > { %108 = sbr.rel (%p105_p3) target bundleno = 106 (0x6a), region = 24  ;;  %p126_p5 = scmp.lt.s32.totalorder (!%p105_p3), %s450_s10, 63 }
   0xe   : > { %s660_s6 = smov (!%p132_p4, %s494_s6), 1  ;;  %s662_s10 = smov (!%p126_p5, %s450_s10), 63 }
   0xf   : > { %s452_s11 = sshll.u32 %s660_s6, 3  ;;  %s451_s15 = sshll.u32 %s662_s10, 3 }
  0x10   : > { %s536_s14 = scalar_lea.vmem %s654_s1, %s452_s11  ;;  %s543_s18 = scalar_lea.vmem %s653_s0, %s451_s15 }
  0x11   : > { %141 = vst.msk [vmem:[%s536_s14] sm:$0xff] %vm140_vm0, %v504_v0  ;;  %v142_v1 = vld [vmem:[%s543_s18] sm:$0xff]  ;;  %v143_v2 = vld [vmem:[%s543_s18 + $0x8] sm:$0xff]  ;;  %v144_v3 = vld [vmem:[%s543_s18 + $0x10] sm:$0xff] }
  0x12   : > { %v145_v4 = vld [vmem:[%s543_s18 + $0x18] sm:$0xff]  ;;  %v174_v5 = vmax.f32 %v142_v1, 0.0  ;;  %v175_v6 = vmax.f32 %v143_v2, 0.0  ;;  %v176_v7 = vmax.f32 %v144_v3, 0.0  ;;  %v146_v8 = vld [vmem:[%s543_s18 + $0x20] sm:$0xff]  ;;  %v147_v13 = vld [vmem:[%s543_s18 + $0x28] sm:$0xff] }
  0x13   : > { %v177_v10 = vmax.f32 %v145_v4, 0.0  ;;  %v178_v15 = vmax.f32 %v146_v8, 0.0  ;;  %v148_v17 = vld [vmem:[%s543_s18 + $0x30] sm:$0xff]  ;;  %v179_v19 = vmax.f32 %v147_v13, 0.0  ;;  %v149_v21 = vld [vmem:[%s543_s18 + $0x38] sm:$0xff]  ;;  %v150_v25 = vld [vmem:[%s543_s18 + $0x40] sm:$0xff] }
  0x14   : > { %v207_v9 = vsel %vm140_vm0, %v174_v5, 0.0  ;;  %v208_v11 = vsel %vm140_vm0, %v175_v6, 0.0  ;;  %v210_v12 = vsel %vm140_vm0, %v176_v7, 0.0  ;;  %v180_v23 = vmax.f32 %v148_v17, 0.0  ;;  %v151_v29 = vld [vmem:[%s543_s18 + $0x48] sm:$0xff]  ;;  %v152_v33 = vld [vmem:[%s543_s18 + $0x50] sm:$0xff] }
  0x15   : > { %v209_v14 = vadd.f32 %v208_v11, %v207_v9  ;;  %v212_v16 = vsel %vm140_vm0, %v177_v10, 0.0  ;;  %v214_v20 = vsel %vm140_vm0, %v178_v15, 0.0  ;;  %v216_v24 = vsel %vm140_vm0, %v179_v19, 0.0  ;;  %v153_v35 = vld [vmem:[%s543_s18 + $0x58] sm:$0xff]  ;;  %v154_v45 = vld [vmem:[%s543_s18 + $0x60] sm:$0xff]  ;;  %v155_v52 = vld [vmem:[%s543_s18 + $0x68] sm:$0xff] }
  0x16   : > { %v181_v27 = vmax.f32 %v149_v21, 0.0  ;;  %v218_v28 = vsel %vm140_vm0, %v180_v23, 0.0  ;;  %v182_v31 = vmax.f32 %v150_v25, 0.0  ;;  %v183_v36 = vmax.f32 %v151_v29, 0.0  ;;  %v156_v60 = vld [vmem:[%s543_s18 + $0x70] sm:$0xff]  ;;  %v157_v3 = vld [vmem:[%s543_s18 + $0x78] sm:$0xff] }
  0x17   : > { %v211_v18 = vadd.f32 %v210_v12, %v209_v14  ;;  %v276_v38 = vmul.f32 %v174_v5, %v174_v5  ;;  %v277_v39 = vmul.f32 %v175_v6, %v175_v6  ;;  %v278_v41 = vmul.f32 %v176_v7, %v176_v7  ;;  %v159_v17 = vld [vmem:[%s543_s18 + $0x88] sm:$0xff] }
  0x18   : > { %v220_v32 = vsel %vm140_vm0, %v181_v27, 0.0  ;;  %v222_v37 = vsel %vm140_vm0, %v182_v31, 0.0  ;;  %v184_v42 = vmax.f32 %v152_v33, 0.0  ;;  %v224_v43 = vsel %vm140_vm0, %v183_v36, 0.0 }
  0x19   : > { %v213_v22 = vadd.f32 %v212_v16, %v211_v18  ;;  %v279_v44 = vmul.f32 %v177_v10, %v177_v10  ;;  %v185_v46 = vmax.f32 %v153_v35, 0.0  ;;  %v280_v49 = vmul.f32 %v178_v15, %v178_v15  ;;  %v158_v10 = vld [vmem:[%s543_s18 + $0x80] sm:$0xff] }
  0x1a   : > { %v226_v48 = vsel %vm140_vm0, %v184_v42, 0.0  ;;  %v308_v50 = vsel %vm140_vm0, %v276_v38, 0.0  ;;  %v309_v51 = vsel %vm140_vm0, %v277_v39, 0.0  ;;  %v311_v55 = vsel %vm140_vm0, %v278_v41, 0.0  ;;  %v162_v38 = vld [vmem:[%s543_s18 + $0xa0] sm:$0xff] }
  0x1b   : > { %v215_v26 = vadd.f32 %v214_v20, %v213_v22  ;;  %v310_v54 = vadd.f32 %v309_v51, %v308_v50  ;;  %v186_v56 = vmax.f32 %v154_v45, 0.0  ;;  %v228_v57 = vsel %vm140_vm0, %v185_v46, 0.0  ;;  %v163_v45 = vld [vmem:[%s543_s18 + $0xa8] sm:$0xff] }
  0x1c   : > { %v281_v58 = vmul.f32 %v179_v19, %v179_v19  ;;  %v313_v59 = vsel %vm140_vm0, %v279_v44, 0.0  ;;  %v187_v63 = vmax.f32 %v155_v52, 0.0  ;;  %v282_v1 = vmul.f32 %v180_v23, %v180_v23  ;;  %v164_v52 = vld [vmem:[%s543_s18 + $0xb0] sm:$0xff] }
  0x1d   : > { %v217_v30 = vadd.f32 %v216_v24, %v215_v26  ;;  %v312_v62 = vadd.f32 %v311_v55, %v310_v54  ;;  %v230_v0 = vsel %vm140_vm0, %v186_v56, 0.0  ;;  %v315_v2 = vsel %vm140_vm0, %v280_v49, 0.0  ;;  %v160_v24 = vld [vmem:[%s543_s18 + $0x90] sm:$0xff] }
  0x1e   : > { %v188_v6 = vmax.f32 %v156_v60, 0.0  ;;  %v232_v7 = vsel %vm140_vm0, %v187_v63, 0.0  ;;  %v283_v8 = vmul.f32 %v181_v27, %v181_v27  ;;  %v317_v9 = vsel %vm140_vm0, %v281_v58, 0.0 }
  0x1f   : > { %v219_v34 = vadd.f32 %v218_v28, %v217_v30  ;;  %v314_v5 = vadd.f32 %v313_v59, %v312_v62  ;;  %v189_v13 = vmax.f32 %v157_v3, 0.0  ;;  %v284_v15 = vmul.f32 %v182_v31, %v182_v31  ;;  %v161_v31 = vld [vmem:[%s543_s18 + $0x98] sm:$0xff] }
  0x20   : > { %v234_v14 = vsel %vm140_vm0, %v188_v6, 0.0  ;;  %v319_v16 = vsel %vm140_vm0, %v282_v1, 0.0  ;;  %v190_v20 = vmax.f32 %v158_v10, 0.0  ;;  %v285_v22 = vmul.f32 %v183_v36, %v183_v36  ;;  %v165_v59 = vld [vmem:[%s543_s18 + $0xb8] sm:$0xff] }
  0x21   : > { %v221_v40 = vadd.f32 %v220_v32, %v219_v34  ;;  %v316_v12 = vadd.f32 %v315_v2, %v314_v5  ;;  %v236_v21 = vsel %vm140_vm0, %v189_v13, 0.0  ;;  %v321_v23 = vsel %vm140_vm0, %v283_v8, 0.0  ;;  %v166_v2 = vld [vmem:[%s543_s18 + $0xc0] sm:$0xff] }
  0x22   : > { %v191_v27 = vmax.f32 %v159_v17, 0.0  ;;  %v238_v28 = vsel %vm140_vm0, %v190_v20, 0.0  ;;  %v286_v29 = vmul.f32 %v184_v42, %v184_v42  ;;  %v323_v30 = vsel %vm140_vm0, %v284_v15, 0.0 }
  0x23   : > { %v223_v47 = vadd.f32 %v222_v37, %v221_v40  ;;  %v318_v19 = vadd.f32 %v317_v9, %v316_v12  ;;  %v192_v34 = vmax.f32 %v160_v24, 0.0  ;;  %v287_v36 = vmul.f32 %v185_v46, %v185_v46  ;;  %v167_v9 = vld [vmem:[%s543_s18 + $0xc8] sm:$0xff] }
  0x24   : > { %v240_v35 = vsel %vm140_vm0, %v191_v27, 0.0  ;;  %v325_v37 = vsel %vm140_vm0, %v285_v22, 0.0  ;;  %v193_v41 = vmax.f32 %v161_v31, 0.0  ;;  %v288_v42 = vmul.f32 %v186_v56, %v186_v56 }
  0x25   : > { %v225_v53 = vadd.f32 %v224_v43, %v223_v47  ;;  %v320_v26 = vadd.f32 %v319_v16, %v318_v19  ;;  %v242_v43 = vsel %vm140_vm0, %v192_v34, 0.0  ;;  %v327_v44 = vsel %vm140_vm0, %v286_v29, 0.0  ;;  %v168_v16 = vld [vmem:[%s543_s18 + $0xd0] sm:$0xff] }
  0x26   : > { %v194_v49 = vmax.f32 %v162_v38, 0.0  ;;  %v244_v50 = vsel %vm140_vm0, %v193_v41, 0.0  ;;  %v289_v46 = vmul.f32 %v187_v63, %v187_v63  ;;  %v329_v51 = vsel %vm140_vm0, %v287_v36, 0.0 }
  0x27   : > { %v227_v61 = vadd.f32 %v226_v48, %v225_v53  ;;  %v322_v33 = vadd.f32 %v321_v23, %v320_v26  ;;  %v195_v55 = vmax.f32 %v163_v45, 0.0  ;;  %v290_v56 = vmul.f32 %v188_v6, %v188_v6  ;;  %v169_v23 = vld [vmem:[%s543_s18 + $0xd8] sm:$0xff] }
  0x28   : > { %v331_v58 = vsel %vm140_vm0, %v288_v42, 0.0  ;;  %v196_v62 = vmax.f32 %v164_v52, 0.0  ;;  %v291_v63 = vmul.f32 %v189_v13, %v189_v13  ;;  %v333_v1 = vsel %vm140_vm0, %v289_v46, 0.0 }
  0x29   : > { %v229_v4 = vadd.f32 %v228_v57, %v227_v61  ;;  %v324_v40 = vadd.f32 %v323_v30, %v322_v33  ;;  %v246_v57 = vsel %vm140_vm0, %v194_v49, 0.0  ;;  %v197_v5 = vmax.f32 %v165_v59, 0.0  ;;  %v170_v30 = vld [vmem:[%s543_s18 + $0xe0] sm:$0xff] }
  0x2a   : > { %v292_v6 = vmul.f32 %v190_v20, %v190_v20  ;;  %v335_v8 = vsel %vm140_vm0, %v290_v56, 0.0  ;;  %v198_v12 = vmax.f32 %v166_v2, 0.0  ;;  %v293_v13 = vmul.f32 %v191_v27, %v191_v27 }
  0x2b   : > { %v231_v11 = vadd.f32 %v230_v0, %v229_v4  ;;  %v326_v48 = vadd.f32 %v325_v37, %v324_v40  ;;  %v248_v0 = vsel %vm140_vm0, %v195_v55, 0.0  ;;  %v337_v15 = vsel %vm140_vm0, %v291_v63, 0.0  ;;  %v171_v37 = vld [vmem:[%s543_s18 + $0xe8] sm:$0xff] }
  0x2c   : > { %v199_v19 = vmax.f32 %v167_v9, 0.0  ;;  %v294_v20 = vmul.f32 %v192_v34, %v192_v34  ;;  %v339_v22 = vsel %vm140_vm0, %v292_v6, 0.0  ;;  %v200_v26 = vmax.f32 %v168_v16, 0.0 }
  0x2d   : > { %v233_v18 = vadd.f32 %v232_v7, %v231_v11  ;;  %v328_v54 = vadd.f32 %v327_v44, %v326_v48  ;;  %v250_v7 = vsel %vm140_vm0, %v196_v62, 0.0  ;;  %v295_v27 = vmul.f32 %v193_v41, %v193_v41  ;;  %v172_v44 = vld [vmem:[%s543_s18 + $0xf0] sm:$0xff] }
  0x2e   : > { %v341_v29 = vsel %vm140_vm0, %v293_v13, 0.0  ;;  %v201_v33 = vmax.f32 %v169_v23, 0.0  ;;  %v296_v34 = vmul.f32 %v194_v49, %v194_v49  ;;  %v343_v36 = vsel %vm140_vm0, %v294_v20, 0.0 }
  0x2f   : > { %v235_v25 = vadd.f32 %v234_v14, %v233_v18  ;;  %v330_v61 = vadd.f32 %v329_v51, %v328_v54  ;;  %v252_v14 = vsel %vm140_vm0, %v197_v5, 0.0  ;;  %v202_v40 = vmax.f32 %v170_v30, 0.0 }
  0x30   : > { %v297_v41 = vmul.f32 %v195_v55, %v195_v55  ;;  %v345_v42 = vsel %vm140_vm0, %v295_v27, 0.0  ;;  %v203_v48 = vmax.f32 %v171_v37, 0.0  ;;  %v298_v46 = vmul.f32 %v196_v62, %v196_v62  ;;  %v173_v55 = vld [vmem:[%s543_s18 + $0xf8] sm:$0xff] }
  0x31   : > { %v237_v32 = vadd.f32 %v236_v21, %v235_v25  ;;  %v332_v4 = vadd.f32 %v331_v58, %v330_v61  ;;  %v254_v21 = vsel %vm140_vm0, %v198_v12, 0.0  ;;  %v347_v49 = vsel %vm140_vm0, %v296_v34, 0.0 }
  0x32   : > { %v264_v54 = vsel %vm140_vm0, %v203_v48, 0.0  ;;  %v349_v56 = vsel %vm140_vm0, %v297_v41, 0.0  ;;  %v300_v61 = vmul.f32 %v198_v12, %v198_v12  ;;  %v301_v2 = vmul.f32 %v199_v19, %v199_v19 }
  0x33   : > { %v239_v39 = vadd.f32 %v238_v28, %v237_v32  ;;  %v334_v11 = vadd.f32 %v333_v1, %v332_v4  ;;  %v256_v28 = vsel %vm140_vm0, %v199_v19, 0.0  ;;  %v205_v1 = vmax.f32 %v173_v55, 0.0 }
  0x34   : > { %v302_v6 = vmul.f32 %v200_v26, %v200_v26  ;;  %v304_v13 = vmul.f32 %v202_v40, %v202_v40 }
  0x35   : > { %v241_v47 = vadd.f32 %v240_v35, %v239_v39  ;;  %v336_v18 = vadd.f32 %v335_v8, %v334_v11  ;;  %v258_v35 = vsel %vm140_vm0, %v200_v26, 0.0  ;;  %v355_v8 = vsel %vm140_vm0, %v300_v61, 0.0 }
  0x36   : > { %v357_v11 = vsel %vm140_vm0, %v301_v2, 0.0 }
  0x37   : > { %v243_v53 = vadd.f32 %v242_v43, %v241_v47  ;;  %v338_v25 = vadd.f32 %v337_v15, %v336_v18  ;;  %v260_v43 = vsel %vm140_vm0, %v201_v33, 0.0  ;;  %v359_v15 = vsel %vm140_vm0, %v302_v6, 0.0 }
  0x39   : > { %v245_v60 = vadd.f32 %v244_v50, %v243_v53  ;;  %v340_v32 = vadd.f32 %v339_v22, %v338_v25  ;;  %v262_v50 = vsel %vm140_vm0, %v202_v40, 0.0  ;;  %v204_v53 = vmax.f32 %v172_v44, 0.0 }
  0x3a   : > { %v363_v22 = vsel %vm140_vm0, %v304_v13, 0.0 }
  0x3b   : > { %v247_v3 = vadd.f32 %v246_v57, %v245_v60  ;;  %v342_v39 = vadd.f32 %v341_v29, %v340_v32  ;;  %v299_v57 = vmul.f32 %v197_v5, %v197_v5  ;;  %v266_v60 = vsel %vm140_vm0, %v204_v53, 0.0 }
  0x3c   : > { %v268_v5 = vsel %vm140_vm0, %v205_v1, 0.0  ;;  %v306_v20 = vmul.f32 %v204_v53, %v204_v53 }
  0x3d   : > { %v249_v10 = vadd.f32 %v248_v0, %v247_v3  ;;  %v344_v47 = vadd.f32 %v343_v36, %v342_v39  ;;  %v351_v0 = vsel %vm140_vm0, %v298_v46, 0.0  ;;  %v353_v3 = vsel %vm140_vm0, %v299_v57, 0.0 }
  0x3e   : > { %v367_v27 = vsel %vm140_vm0, %v306_v20, 0.0 }
  0x3f   : > { %v251_v17 = vadd.f32 %v250_v7, %v249_v10  ;;  %v346_v52 = vadd.f32 %v345_v42, %v344_v47  ;;  %v303_v10 = vmul.f32 %v201_v33, %v201_v33  ;;  %v377_v42 = vld [vmem:[%s536_s14] sm:$0xff] }
  0x41   : > { %v253_v24 = vadd.f32 %v252_v14, %v251_v17  ;;  %v348_v59 = vadd.f32 %v347_v49, %v346_v52  ;;  %v305_v17 = vmul.f32 %v203_v48, %v203_v48  ;;  %v361_v18 = vsel %vm140_vm0, %v303_v10, 0.0 }
  0x43   : > { %v255_v31 = vadd.f32 %v254_v21, %v253_v24  ;;  %v350_v62 = vadd.f32 %v349_v56, %v348_v59  ;;  %v307_v24 = vmul.f32 %v205_v1, %v205_v1  ;;  %v365_v25 = vsel %vm140_vm0, %v305_v17, 0.0 }
  0x45   : > { %v257_v38 = vadd.f32 %v256_v28, %v255_v31  ;;  %v352_v7 = vadd.f32 %v351_v0, %v350_v62  ;;  %v369_v30 = vsel %vm140_vm0, %v307_v24, 0.0 }
  0x47   : > { %v259_v45 = vadd.f32 %v258_v35, %v257_v38  ;;  %v354_v9 = vadd.f32 %v353_v3, %v352_v7 }
  0x49   : > { %v261_v51 = vadd.f32 %v260_v43, %v259_v45  ;;  %v356_v14 = vadd.f32 %v355_v8, %v354_v9 }
  0x4b   : > { %v263_v58 = vadd.f32 %v262_v50, %v261_v51  ;;  %v358_v16 = vadd.f32 %v357_v11, %v356_v14 }
  0x4d   : > { %v265_v63 = vadd.f32 %v264_v54, %v263_v58  ;;  %v360_v21 = vadd.f32 %v359_v15, %v358_v16 }
  0x4f   : > { %v267_v4 = vadd.f32 %v266_v60, %v265_v63  ;;  %v362_v23 = vadd.f32 %v361_v18, %v360_v21 }
  0x51   : > { %v269_v12 = vadd.f32 %v268_v5, %v267_v4  ;;  %v364_v28 = vadd.f32 %v363_v22, %v362_v23 }
  0x53   : > { %v270_v19 = vrot.slane %v269_v12, 4  ;;  %v366_v29 = vadd.f32 %v365_v25, %v364_v28 }
  0x55   : > { %v271_v26 = vadd.f32 %v270_v19, %v269_v12  ;;  %v368_v32 = vadd.f32 %v367_v27, %v366_v29 }
  0x57   : > { %v272_v31 = vrot.slane %v271_v26, 2  ;;  %v370_v33 = vadd.f32 %v369_v30, %v368_v32 }
  0x59   : > { %v273_v35 = vadd.f32 %v272_v31, %v271_v26  ;;  %v371_v34 = vrot.slane %v370_v33, 4 }
  0x5b   : > { %v372_v36 = vadd.f32 %v371_v34, %v370_v33  ;;  %v274_v37 = vrot.slane %v273_v35, 1 }
  0x5d   : > { %v373_v38 = vrot.slane %v372_v36, 2  ;;  %v275_v40 = vadd.f32 %v274_v37, %v273_v35 }
  0x5f   : > { %v374_v39 = vadd.f32 %v373_v38, %v372_v36 }
  0x61   : > { %v375_v43 = vrot.slane %v374_v39, 1 }
  0x63   : > { %v376_v41 = vadd.f32 %v375_v43, %v374_v39 }
  0x65   : > { %v379_v44 = vsel %vm378_vm1, %v275_v40, %v376_v41 }
  0x66   : > { %v381_v45 = vsel %vm380_vm2, %v379_v44, 0.0 }
  0x67   : > { %v382_v47 = vadd.f32 %v381_v45, %v377_v42 }
  0x69   : > { %383 = vst.msk [vmem:[%s536_s14] sm:$0xff] %vm140_vm0, %v382_v47 }
  0x6a PF: > { %s11_s8 = sadd.s32 1, %s502_s8   ;;  %s655_s6 = smov %s498_s7 }
  0x6b   : > { %p8_p6 = scmp.ge.s32.totalorder %s11_s8, 4   ;;  %s656_s7 = smov %s658_s9 }
  0x6d   :  { %10 = sbr.rel (!%p8_p6) target bundleno = 2 (0x2), region = 58 }

</bundles_post_ra>
